<compile_context>
chip_gen: v6e
topology: v6e:2x2x1
jax: 0.10.0
libtpu: 0.0.40
codegen_flags: <defaults>
</compile_context>

<pallas_src>
import jax
import jax.numpy as jnp
from jax.experimental import pallas as pl
from jax.experimental.pallas import tpu as pltpu


def _round_up(n: int, m: int) -> int:
    return ((n + m - 1) // m) * m


def _make_mlp_kernel(num_hidden_layers: int, compute_dtype):
    """Kernel for [Linear -> LeakyReLU(0.1)]*N -> Linear(->1).

    Ref order: (x, w1, b1, ..., wN, bN, w_out, b_out, o)
      x     : (TB, F)         f32   (batch tile, untransposed; cast in-kernel)
      w_i   : (H_i, H_{i-1})  compute dtype (PyTorch (out, in) layout)
      b_i   : (H_i, 1)        f32
      w_out : (1, H_N)        compute dtype
      b_out : (1, 1)          f32
      o     : (1, TB)         f32   (lane-dense output tile, batch on lanes)
    """
    contract_last = (((1,), (1,)), ((), ()))  # contract last dim of both operands

    def kernel(*refs):
        x_ref, o_ref = refs[0], refs[-1]
        w_out_ref, b_out_ref = refs[-3], refs[-2]

        # (TB, F) f32 -> compute dtype in-kernel (no extra HBM pass in the wrapper).
        h = x_ref[...].astype(compute_dtype)

        for li in range(num_hidden_layers):
            w_ref = refs[1 + 2 * li]
            b_ref = refs[2 + 2 * li]
            if li == 0:
                # First layer: MXU consumes the transposed rhs directly
                # ((H1, F) x (TB, F)^T -> (H1, TB)); batch lands on the lane axis.
                z = jax.lax.dot_general(
                    w_ref[...], h,
                    dimension_numbers=contract_last,
                    preferred_element_type=jnp.float32)
            else:
                z = jnp.dot(w_ref[...], h, preferred_element_type=jnp.float32)
            z = z + b_ref[...]                    # f32 bias add off the MXU accumulator
            h = z.astype(compute_dtype)           # single cast per layer
            h = jnp.maximum(h, h * 0.1)           # LeakyReLU(0.1): 2 VPU ops, bf16-native

        # Final out_features == 1 layer on the MXU (it has huge slack here).
        if num_hidden_layers == 0:
            o = jax.lax.dot_general(w_out_ref[...], h,
                                    dimension_numbers=contract_last,
                                    preferred_element_type=jnp.float32)
        else:
            o = jnp.dot(w_out_ref[...], h, preferred_element_type=jnp.float32)
        o_ref[...] = (o + b_out_ref[...]).astype(o_ref.dtype)   # (1, TB) lane-dense

    return kernel


def range_network_forward(x, params, *, block_rows=16384,
                          compute_dtype=jnp.bfloat16,
                          vmem_limit_bytes=48 * 1024 * 1024):
    """RangeNetwork forward pass as a single batch-tiled Pallas call.

    x:      (B, input_size) float32
    params: list of (weight, bias) in PyTorch nn.Linear layout
            (weight: (out_features, in_features), bias: (out_features,)),
            last layer has out_features == 1.
    returns (B, 1) float32
    """
    B, F = x.shape
    *hidden, (w_out, b_out) = params
    assert w_out.shape[0] == 1, "final layer must have out_features == 1"

    # Batch tile: multiple of 128 (lane width), as large as comfortably fits VMEM.
    tb = _round_up(min(int(block_rows), _round_up(B, 128)), 128)
    b_pad = _round_up(B, tb)

    # Only pad the batch (no transpose, no cast): one cheap pass at most.
    x_in = x if b_pad == B else jnp.pad(x, ((0, b_pad - B), (0, 0)))

    inputs = [x_in]
    in_specs = [pl.BlockSpec((tb, F), lambda i: (i, 0))]
    for w, b in hidden:
        inputs.append(w.astype(compute_dtype))                      # (H_out, H_in)
        inputs.append(b.reshape(-1, 1).astype(jnp.float32))         # (H_out, 1)
        in_specs.append(pl.BlockSpec(w.shape, lambda i: (0, 0)))    # constant -> VMEM-resident
        in_specs.append(pl.BlockSpec((w.shape[0], 1), lambda i: (0, 0)))
    inputs.append(w_out.astype(compute_dtype))                      # (1, H_last)
    inputs.append(b_out.reshape(1, 1).astype(jnp.float32))          # (1, 1)
    in_specs.append(pl.BlockSpec(w_out.shape, lambda i: (0, 0)))
    in_specs.append(pl.BlockSpec((1, 1), lambda i: (0, 0)))

    out = pl.pallas_call(
        _make_mlp_kernel(len(hidden), compute_dtype),
        grid=(b_pad // tb,),
        in_specs=in_specs,
        out_specs=pl.BlockSpec((1, tb), lambda i: (0, i)),           # lane-dense output
        out_shape=jax.ShapeDtypeStruct((1, b_pad), jnp.float32),
        compiler_params=pltpu.CompilerParams(
            dimension_semantics=("parallel",),       # v7x: shard batch tiles across TCs
            vmem_limit_bytes=vmem_limit_bytes,
        ),
    )(*inputs)

    return out[0, :B].reshape(B, 1)


def init_params(key, input_size, hidden_sizes):
    """PyTorch-style nn.Linear init: U(-1/sqrt(fan_in), 1/sqrt(fan_in)); weight is (out, in)."""
    sizes = [input_size] + list(hidden_sizes) + [1]
    keys = jax.random.split(key, len(sizes) - 1)
    params = []
    for li in range(len(sizes) - 1):
        fan_in, fan_out = sizes[li], sizes[li + 1]
        kw, kb = jax.random.split(keys[li])
        bound = 1.0 / (fan_in ** 0.5)
        w = jax.random.uniform(kw, (fan_out, fan_in), jnp.float32, -bound, bound)
        b = jax.random.uniform(kb, (fan_out,), jnp.float32, -bound, bound)
        params.append((w, b))
    return params


def reference_forward(x, params):
    """Pure-JAX reference (HIGHEST matmul precision) matching the PyTorch module."""
    *hidden, (w_out, b_out) = params
    h = x
    for w, b in hidden:
        h = jnp.dot(h, w.T, precision=jax.lax.Precision.HIGHEST) + b
        h = jnp.where(h >= 0, h, 0.1 * h)
    return jnp.dot(h, w_out.T, precision=jax.lax.Precision.HIGHEST) + b_out


if __name__ == "__main__":
    key = jax.random.PRNGKey(0)
    k_x1, k_x2, k_p = jax.random.split(key, 3)

    input_size = 16
    hidden_sizes = [32, 64]
    params = init_params(k_p, input_size, hidden_sizes)

    # Case 1: tiny batch, single tile, f32 compute -> tight-ish check against reference.
    x_small = jax.random.normal(k_x1, (8, input_size), jnp.float32)
    out_small = jax.block_until_ready(
        range_network_forward(x_small, params, compute_dtype=jnp.float32))
    ref_small = reference_forward(x_small, params)
    assert out_small.shape == (8, 1)
    assert jnp.allclose(out_small, ref_small, atol=2e-2, rtol=2e-2), \
        float(jnp.max(jnp.abs(out_small - ref_small)))

    # Case 2: multi-tile grid with batch padding, bf16 compute -> loose check.
    x_big = jax.random.normal(k_x2, (300, input_size), jnp.float32)
    out_big = jax.block_until_ready(
        range_network_forward(x_big, params, block_rows=128, compute_dtype=jnp.bfloat16))
    ref_big = reference_forward(x_big, params)
    assert out_big.shape == (300, 1)
    assert jnp.allclose(out_big, ref_big, atol=5e-2, rtol=5e-2), \
        float(jnp.max(jnp.abs(out_big - ref_big)))

    print("KERNEL_OK")
</pallas_src>

<mosaic_0001>
module attributes {stable_mosaic.version = 11 : i64} {
  func.func @kernel(%arg0: i32, %arg1: memref<128x16xf32, #tpu.memory_space<vmem>>, %arg2: memref<32x16xf32, #tpu.memory_space<vmem>>, %arg3: memref<32x1xf32, #tpu.memory_space<vmem>>, %arg4: memref<64x32xf32, #tpu.memory_space<vmem>>, %arg5: memref<64x1xf32, #tpu.memory_space<vmem>>, %arg6: memref<1x64xf32, #tpu.memory_space<vmem>>, %arg7: memref<1x1xf32, #tpu.memory_space<vmem>>, %arg8: memref<1x128xf32, #tpu.memory_space<vmem>>) attributes {dimension_semantics = [#tpu.dimension_semantics<parallel>], iteration_bounds = array<i64: 1>, scalar_prefetch = 0 : i64, scratch_operands = 0 : i64, tpu.core_type = #tpu.core_type<tc>, window_params = [{transform_indices = @transform_0, window_bounds = array<i64: 128, 16>}, {pipeline_mode = #tpu.pipeline_mode<synchronous>, transform_indices = @transform_1, window_bounds = array<i64: 32, 16>}, {pipeline_mode = #tpu.pipeline_mode<synchronous>, transform_indices = @transform_2, window_bounds = array<i64: 32, 1>}, {pipeline_mode = #tpu.pipeline_mode<synchronous>, transform_indices = @transform_3, window_bounds = array<i64: 64, 32>}, {pipeline_mode = #tpu.pipeline_mode<synchronous>, transform_indices = @transform_4, window_bounds = array<i64: 64, 1>}, {pipeline_mode = #tpu.pipeline_mode<synchronous>, transform_indices = @transform_5, window_bounds = array<i64: 1, 64>}, {pipeline_mode = #tpu.pipeline_mode<synchronous>, transform_indices = @transform_6, window_bounds = array<i64: 1, 1>}, {transform_indices = @transform_7, window_bounds = array<i64: 1, 128>}]} {
    %c0 = arith.constant 0 : index
    %c0_0 = arith.constant 0 : index
    %0 = vector.load %arg1[%c0, %c0_0] : memref<128x16xf32, #tpu.memory_space<vmem>>, vector<128x16xf32>
    %c0_1 = arith.constant 0 : index
    %c0_2 = arith.constant 0 : index
    %1 = vector.load %arg2[%c0_1, %c0_2] : memref<32x16xf32, #tpu.memory_space<vmem>>, vector<32x16xf32>
    %cst = arith.constant dense<0.000000e+00> : vector<32x128xf32>
    %2 = tpu.matmul %1, %0, %cst {dimension_numbers = #tpu.dot_dimension_numbers<[1], [1], [0], [0], [0, 0, 1, 0], [], []>} : vector<32x16xf32>, vector<128x16xf32>, vector<32x128xf32> -> vector<32x128xf32>
    %c0_3 = arith.constant 0 : index
    %c0_4 = arith.constant 0 : index
    %3 = vector.load %arg3[%c0_3, %c0_4] : memref<32x1xf32, #tpu.memory_space<vmem>>, vector<32x1xf32>
    %4 = vector.broadcast %3 : vector<32x1xf32> to vector<32x128xf32>
    %5 = arith.addf %2, %4 : vector<32x128xf32>
    %cst_5 = arith.constant 1.000000e-01 : f32
    %6 = vector.broadcast %cst_5 : f32 to vector<32x128xf32>
    %7 = arith.mulf %5, %6 : vector<32x128xf32>
    %8 = arith.maximumf %5, %7 : vector<32x128xf32>
    %c0_6 = arith.constant 0 : index
    %c0_7 = arith.constant 0 : index
    %9 = vector.load %arg4[%c0_6, %c0_7] : memref<64x32xf32, #tpu.memory_space<vmem>>, vector<64x32xf32>
    %cst_8 = arith.constant dense<0.000000e+00> : vector<64x128xf32>
    %10 = tpu.matmul %9, %8, %cst_8 {dimension_numbers = #tpu.dot_dimension_numbers<[1], [0], [0], [1], [0, 0, 1, 1], [], []>} : vector<64x32xf32>, vector<32x128xf32>, vector<64x128xf32> -> vector<64x128xf32>
    %c0_9 = arith.constant 0 : index
    %c0_10 = arith.constant 0 : index
    %11 = vector.load %arg5[%c0_9, %c0_10] : memref<64x1xf32, #tpu.memory_space<vmem>>, vector<64x1xf32>
    %12 = vector.broadcast %11 : vector<64x1xf32> to vector<64x128xf32>
    %13 = arith.addf %10, %12 : vector<64x128xf32>
    %cst_11 = arith.constant 1.000000e-01 : f32
    %14 = vector.broadcast %cst_11 : f32 to vector<64x128xf32>
    %15 = arith.mulf %13, %14 : vector<64x128xf32>
    %16 = arith.maximumf %13, %15 : vector<64x128xf32>
    %c0_12 = arith.constant 0 : index
    %c0_13 = arith.constant 0 : index
    %17 = vector.load %arg6[%c0_12, %c0_13] : memref<1x64xf32, #tpu.memory_space<vmem>>, vector<1x64xf32>
    %cst_14 = arith.constant dense<0.000000e+00> : vector<1x128xf32>
    %18 = tpu.matmul %17, %16, %cst_14 {dimension_numbers = #tpu.dot_dimension_numbers<[1], [0], [0], [1], [0, 0, 1, 1], [], []>} : vector<1x64xf32>, vector<64x128xf32>, vector<1x128xf32> -> vector<1x128xf32>
    %c0_15 = arith.constant 0 : index
    %c0_16 = arith.constant 0 : index
    %19 = vector.load %arg7[%c0_15, %c0_16] : memref<1x1xf32, #tpu.memory_space<vmem>>, vector<1x1xf32>
    %20 = vector.broadcast %19 : vector<1x1xf32> to vector<1x128xf32>
    %21 = arith.addf %18, %20 : vector<1x128xf32>
    %c0_17 = arith.constant 0 : index
    %c0_18 = arith.constant 0 : index
    %22 = vector.load %arg8[%c0_17, %c0_18] : memref<1x128xf32, #tpu.memory_space<vmem>>, vector<1x128xf32>
    tpu.vector_store %arg8[%c0_17, %c0_18], %21 {strides = array<i32>} : memref<1x128xf32, #tpu.memory_space<vmem>>, vector<1x128xf32>,
    return
  }
  func.func @transform_0(%arg0: i32) -> (i32, i32) {
    %c0_i32 = arith.constant 0 : i32
    %c0_i32_0 = arith.constant 0 : i32
    return %arg0, %c0_i32 : i32, i32
  }
  func.func @transform_1(%arg0: i32) -> (i32, i32) {
    %c0_i32 = arith.constant 0 : i32
    %c0_i32_0 = arith.constant 0 : i32
    %c0_i32_1 = arith.constant 0 : i32
    return %c0_i32, %c0_i32_0 : i32, i32
  }
  func.func @transform_2(%arg0: i32) -> (i32, i32) {
    %c0_i32 = arith.constant 0 : i32
    %c0_i32_0 = arith.constant 0 : i32
    %c0_i32_1 = arith.constant 0 : i32
    return %c0_i32, %c0_i32_0 : i32, i32
  }
  func.func @transform_3(%arg0: i32) -> (i32, i32) {
    %c0_i32 = arith.constant 0 : i32
    %c0_i32_0 = arith.constant 0 : i32
    %c0_i32_1 = arith.constant 0 : i32
    return %c0_i32, %c0_i32_0 : i32, i32
  }
  func.func @transform_4(%arg0: i32) -> (i32, i32) {
    %c0_i32 = arith.constant 0 : i32
    %c0_i32_0 = arith.constant 0 : i32
    %c0_i32_1 = arith.constant 0 : i32
    return %c0_i32, %c0_i32_0 : i32, i32
  }
  func.func @transform_5(%arg0: i32) -> (i32, i32) {
    %c0_i32 = arith.constant 0 : i32
    %c0_i32_0 = arith.constant 0 : i32
    %c0_i32_1 = arith.constant 0 : i32
    return %c0_i32, %c0_i32_0 : i32, i32
  }
  func.func @transform_6(%arg0: i32) -> (i32, i32) {
    %c0_i32 = arith.constant 0 : i32
    %c0_i32_0 = arith.constant 0 : i32
    %c0_i32_1 = arith.constant 0 : i32
    return %c0_i32, %c0_i32_0 : i32, i32
  }
  func.func @transform_7(%arg0: i32) -> (i32, i32) {
    %c0_i32 = arith.constant 0 : i32
    %c0_i32_0 = arith.constant 0 : i32
    return %c0_i32, %arg0 : i32, i32
  }
}

</mosaic_0001>

<bundles_post_ra>
// kernel: tpu_custom_call.1
= control target key start
LH: loop header
LB: loop body
LE: loop exit
PB: predicated region body
PF: predicated region fallthrough
CT: control target
= control target key end

     0   :  { %s921_s0 = inlined_call_operand.vmem [shape: f32[128,16], index: 0, kind: input, shape index: {}]   ;;  %s922_s1 = inlined_call_operand.vmem [shape: f32[32,16], index: 1, kind: input, shape index: {}]   ;;  %s923_s2 = inlined_call_operand.vmem [shape: f32[32,1], index: 2, kind: input, shape index: {}]   ;;  %s924_s3 = inlined_call_operand.vmem [shape: f32[64,32], index: 3, kind: input, shape index: {}]   ;;  %s925_s4 = inlined_call_operand.vmem [shape: f32[64,1], index: 4, kind: input, shape index: {}]   ;;  %s926_s5 = inlined_call_operand.vmem [shape: f32[1,64], index: 5, kind: input, shape index: {}]   ;;  %s927_s6 = inlined_call_operand.<no memory space> [shape: f32[1,1], index: 6, kind: input, shape index: {}]   ;;  %s928_s7 = inlined_call_operand.hbm [shape: f32[1,128], index: 7, kind: output, shape index: {}]  }
   0x1   :  { %v12_v0 = vstv %s927_s6 }
   0x2   :  { %13 = vst [vmem:[#allocation2] sm:$0x1] %v12_v0 }
   0x3   :  { %v44_v1 = vld [vmem:[%s921_s0 + $0x78] sm:$0xff]  ;;  %vm73_vm0 = vcmask 130048   ;;  %v43_v2 = vld [vmem:[%s921_s0 + $0x70] sm:$0xff]  ;;  %v704_v3 = vmov 0   ;;  %v42_v4 = vld [vmem:[%s921_s0 + $0x68] sm:$0xff] }
   0x4   :  { %599 = vmatprep.subr.msk.mxu0 %vm73_vm0, %v44_v1  ;;  %680 = vset.pattern.permute.xlu0 %v704_v3  ;;  %v45_v5 = vld [vmem:[%s922_s1] sm:$0xff]  ;;  %v52_v6 = vld [vmem:[%s923_s2 + $0x18] sm:$0xff]  ;;  %v50_v7 = vld [vmem:[%s923_s2 + $0x8] sm:$0xff] }
   0x5   :  { %600 = vmatpush3.xpose.msk.msra.mxu0 %vm73_vm0, %v44_v1  ;;  %681 = vset.pattern.permute.xlu1 %v704_v3  ;;  %v41_v8 = vld [vmem:[%s921_s0 + $0x60] sm:$0xff]  ;;  %v51_v9 = vld [vmem:[%s923_s2 + $0x10] sm:$0xff] }
   0x6   :  { %601 = vmatprep.subr.msk.mxu0 %vm73_vm0, %v43_v2  ;;  %631 = vmatprep.mubr.msk.f32.mxu0 %vm73_vm0, %v45_v5  ;;  %v49_v10 = vld [vmem:[%s923_s2] sm:$0xff] }
   0x7   :  { %70 = vperm.xlu0 %680, %v52_v6   ;;  %60 = vperm.xlu1 %681, %v50_v7  }
   0x9   :  { %602 = vmatpush3.xpose.msk.msra.mxu0 %vm73_vm0, %v43_v2 }
   0xa   :  { %603 = vmatprep.subr.msk.mxu0 %vm73_vm0, %v42_v4 }
   0xb   :  { %65 = vperm.xlu0 %680, %v51_v9  }
   0xd   :  { %604 = vmatpush3.xpose.msk.msra.mxu0 %vm73_vm0, %v42_v4 }
   0xe   :  { %605 = vmatprep.subr.msk.mxu0 %vm73_vm0, %v41_v8 }
   0xf   :  { %14 = vsyncpa [#allocation4], 0  ;;  %v40_v11 = vld [vmem:[%s921_s0 + $0x58] sm:$0xff]  ;;  %55 = vperm.xlu1 %681, %v49_v10   ;;  %v241_v13 = vld [vmem:[%s925_s4 + $0x30] sm:$0xff]  ;;  %vm283_vm1 = vcmask 261120   ;;  %v705_v63 = vmov 0.0  }
  0x10   :  { %v242_v12 = vld [vmem:[%s925_s4 + $0x38] sm:$0xff]  ;;  %v39_v14 = vld [vmem:[%s921_s0 + $0x50] sm:$0xff]  ;;  %v240_v15 = vld [vmem:[%s925_s4 + $0x28] sm:$0xff]  ;;  %vm706_vm2 = vmmov 0   ;;  %vm440_vm3 = vcmask 523264   ;;  %s707_s28 = smov [#allocation3]  }
  0x11   :  { %606 = vmatpush3.xpose.msk.msra.mxu0 %vm73_vm0, %v41_v8  ;;  %280 = vperm.xlu0 %680, %v242_v12   ;;  %v239_v16 = vld [vmem:[%s925_s4 + $0x20] sm:$0xff]  ;;  %v38_v17 = vld [vmem:[%s921_s0 + $0x48] sm:$0xff]  ;;  %v238_v18 = vld [vmem:[%s925_s4 + $0x18] sm:$0xff]  ;;  %s521_s29 = sshll.u32 %s707_s28, 4  ;;  %s522_s29 = int_to_ptr.vmem [resolvable:$true] %s521_s29 }
  0x12   :  { %607 = vmatprep.subr.msk.mxu0 %vm73_vm0, %v40_v11  ;;  %v237_v19 = vld [vmem:[%s925_s4 + $0x10] sm:$0xff]  ;;  %v37_v20 = vld [vmem:[%s921_s0 + $0x40] sm:$0xff]  ;;  %v236_v21 = vld [vmem:[%s925_s4 + $0x8] sm:$0xff]  ;;  %s682_s6 = scalar_lea.vmem %s522_s29, 16  ;;  %s686_s30 = scalar_lea.vmem %s522_s29, 32 }
  0x13   :  { %275 = vperm.xlu1 %681, %v241_v13   ;;  %v235_v22 = vld [vmem:[%s925_s4] sm:$0xff]  ;;  %v36_v23 = vld [vmem:[%s921_s0 + $0x38] sm:$0xff]  ;;  %v35_v25 = vld [vmem:[%s921_s0 + $0x30] sm:$0xff]  ;;  %p683_p0 = scmp.ne.s32.totalorder %s522_s29, %s682_s6  ;;  %p687_p1 = scmp.lt.s32.totalorder %s522_s29, %s522_s29 }
  0x14   :  { %v430_v24 = vld [vmem:[#allocation2] sm:$0x1]  ;;  %v34_v26 = vld [vmem:[%s921_s0 + $0x28] sm:$0xff]  ;;  %v32_v28 = vld [vmem:[%s921_s0 + $0x18] sm:$0xff]  ;;  %p688_p2 = scmp.lt.s32.totalorder %s686_s30, %s682_s6 }
  0x15   :  { %608 = vmatpush3.xpose.msk.msra.mxu0 %vm73_vm0, %v40_v11  ;;  %270 = vperm.xlu0 %680, %v240_v15   ;;  %v33_v27 = vld [vmem:[%s921_s0 + $0x20] sm:$0xff]  ;;  %v31_v29 = vld [vmem:[%s921_s0 + $0x10] sm:$0xff]  ;;  %v30_v30 = vld [vmem:[%s921_s0 + $0x8] sm:$0xff] }
  0x16   :  { %609 = vmatprep.subr.msk.mxu0 %vm73_vm0, %v39_v14  ;;  %v29_v31 = vld [vmem:[%s921_s0] sm:$0xff]  ;;  %v46_v32 = vld [vmem:[%s922_s1 + $0x8] sm:$0xff]  ;;  %v47_v33 = vld [vmem:[%s922_s1 + $0x10] sm:$0xff]  ;;  %p689_p3 = por %p688_p2, %p687_p1 }
  0x17   :  { %265 = vperm.xlu1 %681, %v239_v16   ;;  %v48_v34 = vld [vmem:[%s922_s1 + $0x18] sm:$0xff]  ;;  %v227_v35 = vld [vmem:[%s924_s3] sm:$0xff]  ;;  %v228_v56 = vld [vmem:[%s924_s3 + $0x8] sm:$0xff] }
  0x18   :  { %645 = vmatprep.mubr.msk.f32.mxu1 %vm283_vm1, %v227_v35  ;;  %v229_v57 = vld [vmem:[%s924_s3 + $0x10] sm:$0xff]  ;;  %v230_v58 = vld [vmem:[%s924_s3 + $0x18] sm:$0xff]  ;;  %v231_v59 = vld [vmem:[%s924_s3 + $0x20] sm:$0xff]  ;;  %p690_p4 = pnand %p689_p3, %p683_p0 }
  0x19   :  { %610 = vmatpush3.xpose.msk.msra.mxu0 %vm73_vm0, %v39_v14  ;;  %260 = vperm.xlu0 %680, %v238_v18   ;;  %v232_v60 = vld [vmem:[%s924_s3 + $0x28] sm:$0xff]  ;;  %v233_v61 = vld [vmem:[%s924_s3 + $0x30] sm:$0xff]  ;;  %v234_v62 = vld [vmem:[%s924_s3 + $0x38] sm:$0xff] }
  0x1a   :  { %611 = vmatprep.subr.msk.mxu0 %vm73_vm0, %v38_v17 }
  0x1b   :  { %255 = vperm.xlu1 %681, %v237_v19  }
  0x1d   :  { %612 = vmatpush3.xpose.msk.msra.mxu0 %vm73_vm0, %v38_v17  ;;  %250 = vperm.xlu0 %680, %v236_v21  }
  0x1e   :  { %613 = vmatprep.subr.msk.mxu0 %vm73_vm0, %v37_v20 }
  0x1f   :  { %245 = vperm.xlu1 %681, %v235_v22  }
  0x21   :  { %614 = vmatpush3.xpose.msk.msra.mxu0 %vm73_vm0, %v37_v20  ;;  %433 = vperm.xlu0 %680, %v430_v24  }
  0x22   :  { %615 = vmatprep.subr.msk.mxu0 %vm73_vm0, %v36_v23 }
  0x25   :  { %616 = vmatpush3.xpose.msk.msra.mxu0 %vm73_vm0, %v36_v23 }
  0x26   :  { %617 = vmatprep.subr.msk.mxu0 %vm73_vm0, %v35_v25 }
  0x29   :  { %618 = vmatpush3.xpose.msk.msra.mxu0 %vm73_vm0, %v35_v25 }
  0x2a   :  { %619 = vmatprep.subr.msk.mxu0 %vm73_vm0, %v34_v26 }
  0x2d   :  { %620 = vmatpush3.xpose.msk.msra.mxu0 %vm73_vm0, %v34_v26 }
  0x2e   :  { %621 = vmatprep.subr.msk.mxu0 %vm73_vm0, %v33_v27 }
  0x31   :  { %622 = vmatpush3.xpose.msk.msra.mxu0 %vm73_vm0, %v33_v27 }
  0x32   :  { %623 = vmatprep.subr.msk.mxu0 %vm73_vm0, %v32_v28 }
  0x35   :  { %624 = vmatpush3.xpose.msk.msra.mxu0 %vm73_vm0, %v32_v28 }
  0x36   :  { %625 = vmatprep.subr.msk.mxu0 %vm73_vm0, %v31_v29 }
  0x39   :  { %626 = vmatpush3.xpose.msk.msra.mxu0 %vm73_vm0, %v31_v29 }
  0x3a   :  { %627 = vmatprep.subr.msk.mxu0 %vm73_vm0, %v30_v30 }
  0x3d   :  { %628 = vmatpush3.xpose.msk.msra.mxu0 %vm73_vm0, %v30_v30 }
  0x3e   :  { %629 = vmatprep.subr.msk.mxu0 %vm73_vm0, %v29_v31 }
  0x41   :  { %630 = vmatpush3.xpose.msk.msra.mxu0 %vm73_vm0, %v29_v31 }
  0x44   :  { %632 = vmatmul.mubr.msk.f32.vlgmr.msra.gmra.mxu0 %vm73_vm0, %v46_v32 }
  0x45   :  { %634 = vmatprep.mubr.msk.f32.mxu0 %vm73_vm0, %v47_v33 }
  0x48   :  { %635 = vmatmul.mubr.msk.f32.gmra.mxu0 %vm73_vm0, %v48_v34 }
  0x82   :  { %v71_v36 = vpop.permute.xlu0 %70  ;;  %v61_v37 = vpop.permute.xlu1 %60 }
  0x86   :  { %v66_v41 = vpop.permute.xlu0 %65 }
  0x8a   :  { %v56_v44 = vpop.permute.xlu1 %55 }
  0x8c   :  { %v281_v1 = vpop.permute.xlu0 %280 }
  0x8e   :  { %v276_v3 = vpop.permute.xlu1 %275 }
  0x90   :  { %v271_v6 = vpop.permute.xlu0 %270 }
  0x92   :  { %v266_v8 = vpop.permute.xlu1 %265 }
  0x94   :  { %v261_v13 = vpop.permute.xlu0 %260 }
  0x96   :  { %v256_v18 = vpop.permute.xlu1 %255 }
  0x98   :  { %v251_v26 = vpop.permute.xlu0 %250 }
  0x9a   :  { %v246_v30 = vpop.permute.xlu1 %245 }
 0x104   :  { %v633_v38 = vpop.f32.mrf.mxu0 }
 0x105   :  { %v206_v42 = vadd.f32 %v633_v38, %v61_v37 }
 0x106   :  { %v200_v39 = vpop.f32.mrf.mxu0 }
 0x107   :  { %v201_v46 = vadd.f32 %v200_v39, %v56_v44  ;;  %v220_v49 = vmul.f32 0.1, %v206_v42  ;;  %v434_v44 = vpop.permute.xlu0 %433 }
 0x108   :  { %v636_v40 = vpop.f32.mrf.mxu0 }
 0x109   :  { %v216_v43 = vadd.f32 %v636_v40, %v71_v36  ;;  %v219_v52 = vmul.f32 0.1, %v201_v46  ;;  %v224_v54 = vmax.f32 %v206_v42, %v220_v49  ;;  %v429_v40 = vld [vmem:[%s926_s5] sm:$0x1] }
 0x10a   :  { %v210_v45 = vpop.f32.mrf.mxu0 }
 0x10b   :  { %v222_v47 = vmul.f32 0.1, %v216_v43  ;;  %v211_v48 = vadd.f32 %v210_v45, %v66_v41  ;;  %v223_v55 = vmax.f32 %v201_v46, %v219_v52  ;;  %v436_v41 = vlaneseq }
 0x10d   :  { %v221_v50 = vmul.f32 0.1, %v211_v48  ;;  %v226_v51 = vmax.f32 %v216_v43, %v222_v47  ;;  %v437_v42 = vshrl.u32 %v436_v41, 7 }
 0x10f   :  { %v225_v53 = vmax.f32 %v211_v48, %v221_v50  ;;  %637 = vmatprep.subr.mxu1 %v226_v51  ;;  %v438_v43 = vsub.s32 0, %v437_v42 }
 0x110   :  { %638 = vmatpush3.msra.mxu1 %v226_v51 }
 0x111   :  { %639 = vmatprep.subr.mxu1 %v225_v53  ;;  %v439_v45 = vrot.slane %v434_v44, %v438_v43 }
 0x112   :  { %640 = vmatpush3.msra.mxu1 %v225_v53 }
 0x113   :  { %641 = vmatprep.subr.mxu1 %v224_v54 }
 0x114   :  { %642 = vmatpush3.msra.mxu1 %v224_v54 }
 0x115   :  { %643 = vmatprep.subr.mxu1 %v223_v55 }
 0x116   :  { %644 = vmatpush3.msra.mxu1 %v223_v55 }
 0x117   :  { %646 = vmatmul.mubr.msk.f32.vlgmr.msra.gmra.mxu1 %vm283_vm1, %v228_v56  ;;  %657 = vmatprep.subr.mxu1 %v705_v63 }
 0x118   :  { %648 = vmatprep.mubr.msk.f32.mxu1 %vm283_vm1, %v229_v57 }
 0x11b   :  { %649 = vmatmul.mubr.msk.f32.gmra.mxu1 %vm283_vm1, %v230_v58 }
 0x11c   :  { %651 = vmatprep.mubr.msk.f32.mxu1 %vm283_vm1, %v231_v59 }
 0x11f   :  { %652 = vmatmul.mubr.msk.f32.gmra.mxu1 %vm283_vm1, %v232_v60 }
 0x120   :  { %654 = vmatprep.mubr.msk.f32.mxu1 %vm283_vm1, %v233_v61 }
 0x123   :  { %655 = vmatmul.mubr.msk.f32.gmra.mxu1 %vm283_vm1, %v234_v62 }
 0x124   :  { %673 = vmatprep.mubr.msk.f32.mxu1 %vm706_vm2, %v705_v63 }
 0x1d7   :  { %v647_v0 = vpop.f32.mrf.mxu1 }
 0x1d8   :  { %v380_v27 = vadd.f32 %v647_v0, %v251_v26 }
 0x1d9   :  { %v374_v2 = vpop.f32.mrf.mxu1 }
 0x1da   :  { %v375_v31 = vadd.f32 %v374_v2, %v246_v30  ;;  %v414_v34 = vmul.f32 0.1, %v380_v27 }
 0x1db   :  { %v650_v4 = vpop.f32.mrf.mxu1 }
 0x1dc   :  { %v390_v19 = vadd.f32 %v650_v4, %v261_v13  ;;  %v413_v36 = vmul.f32 0.1, %v375_v31  ;;  %v422_v38 = vmax.f32 %v380_v27, %v414_v34 }
 0x1dd   :  { %v384_v5 = vpop.f32.mrf.mxu1 }
 0x1de   :  { %v385_v23 = vadd.f32 %v384_v5, %v256_v18  ;;  %v416_v28 = vmul.f32 0.1, %v390_v19  ;;  %v421_v39 = vmax.f32 %v375_v31, %v413_v36 }
 0x1df   :  { %v653_v7 = vpop.f32.mrf.mxu1 }
 0x1e0   :  { %v400_v11 = vadd.f32 %v653_v7, %v271_v6  ;;  %v415_v32 = vmul.f32 0.1, %v385_v23  ;;  %v424_v35 = vmax.f32 %v390_v19, %v416_v28 }
 0x1e1   :  { %v394_v9 = vpop.f32.mrf.mxu1 }
 0x1e2   :  { %v395_v15 = vadd.f32 %v394_v9, %v266_v8  ;;  %v418_v20 = vmul.f32 0.1, %v400_v11  ;;  %v423_v37 = vmax.f32 %v385_v23, %v415_v32 }
 0x1e3   :  { %v656_v10 = vpop.f32.mrf.mxu1 }
 0x1e4   :  { %v410_v12 = vadd.f32 %v656_v10, %v281_v1  ;;  %v417_v24 = vmul.f32 0.1, %v395_v15  ;;  %v426_v29 = vmax.f32 %v400_v11, %v418_v20 }
 0x1e5   :  { %v404_v14 = vpop.f32.mrf.mxu1 }
 0x1e6   :  { %v420_v16 = vmul.f32 0.1, %v410_v12  ;;  %v405_v17 = vadd.f32 %v404_v14, %v276_v3  ;;  %v425_v33 = vmax.f32 %v395_v15, %v417_v24 }
 0x1e8   :  { %v428_v21 = vmax.f32 %v410_v12, %v420_v16  ;;  %v419_v22 = vmul.f32 0.1, %v405_v17 }
 0x1ea   :  { %v427_v25 = vmax.f32 %v405_v17, %v419_v22  ;;  %658 = vmatpush3.msra.mxu1 %v428_v21 }
 0x1eb   :  { %659 = vmatprep.subr.mxu1 %v705_v63 }
 0x1ec   :  { %660 = vmatpush3.msra.mxu1 %v427_v25 }
 0x1ed   :  { %661 = vmatprep.subr.mxu1 %v705_v63 }
 0x1ee   :  { %662 = vmatpush3.msra.mxu1 %v426_v29 }
 0x1ef   :  { %663 = vmatprep.subr.mxu1 %v705_v63 }
 0x1f0   :  { %664 = vmatpush3.msra.mxu1 %v425_v33 }
 0x1f1   :  { %665 = vmatprep.subr.mxu1 %v705_v63 }
 0x1f2   :  { %666 = vmatpush3.msra.mxu1 %v424_v35 }
 0x1f3   :  { %667 = vmatprep.subr.mxu1 %v705_v63 }
 0x1f4   :  { %668 = vmatpush3.msra.mxu1 %v423_v37 }
 0x1f5   :  { %669 = vmatprep.subr.mxu1 %v705_v63 }
 0x1f6   :  { %670 = vmatpush3.msra.mxu1 %v422_v38 }
 0x1f7   :  { %671 = vmatprep.subr.mxu1 %v705_v63 }
 0x1f8   :  { %672 = vmatpush3.msra.mxu1 %v421_v39 }
 0x1f9   :  { %674 = vmatmul.mubr.msk.f32.vlgmr.msra.gmra.mxu1 %vm440_vm3, %v429_v40 }
 0x2b9   :  { %v510_v46 = vpop.f32.mrf.mxu1 }
 0x2ba   :  { %v511_v47 = vadd.f32 %v510_v46, %v439_v45 }
 0x2bb   :  { %v675_v48 = vpop.f32.mrf.mxu1 }
 0x2bc   :  { %514 = vst [vmem:[#allocation3] sm:$0x1] %v511_v47 }
 0x2bd   :  { %693 = shalt.err (!%p690_p4)
}
 0x2be   :  { %524 = dma.vmem_to_hbm [thread:$0]  %s522_s29, 16, %s928_s7, [#allocation4]  }
 0x2bf   :  { %702 = dma.done.wait [#allocation4], 16  }
 0x2c0   :  { %703 = vsyncadd [#allocation4], 4294967280 }
 0x2c1   :  { %528 = vsyncpa [#allocation4], 1 }

</bundles_post_ra>
